<compile_context>
chip_gen: v7x
topology: tpu7x:2x2x1
jax: 0.10.0
libtpu: 0.0.40
codegen_flags: <defaults>
</compile_context>

<pallas_src>
import functools

import jax
import jax.numpy as jnp
from jax.experimental import pallas as pl
from jax.experimental.pallas import tpu as pltpu

# Safe on v5e (16 MiB default scoped / 128 physical), v6e (32 / 128) and
# v7x (32 / 64).  At real 224x224 scale this would be re-derived per generation.
_VMEM_LIMIT = 32 * 1024 * 1024


def _pick_block_h(H, W, pool):
    """Row-tile height: target matmul M = TH*W ~ 256, divide H, even if pooled."""
    th = min(H, max(2 if pool else 1, 256 // max(W, 1)))
    while th > 1 and (H % th != 0 or (pool and th % 2 != 0)):
        th -= 1
    return max(th, 1)


# ----------------------------------------------------------------------------
# Shared conv epilogue: bias + ReLU (f32) + optional fused 2x2 max-pool + store.
# ----------------------------------------------------------------------------
def _bias_relu_pool_store(acc, b_ref, o_ref, *, th, W, cout, pool):
    out = jnp.maximum(acc + b_ref[...], 0.0)                 # (th*W, cout) f32
    a = out.reshape(th, W, cout)
    if pool:
        a = a.reshape(th // 2, 2, W, cout)                   # leading-dim split only
        r = jnp.maximum(a[:, 0], a[:, 1])                    # (th//2, W, cout)
        cols = [jnp.maximum(r[:, 2 * j:2 * j + 1, :], r[:, 2 * j + 1:2 * j + 2, :])
                for j in range(W // 2)]
        a = jnp.concatenate(cols, axis=1)                    # (th//2, W//2, cout)
    o_ref[0] = a.astype(o_ref.dtype)


# ----------------------------------------------------------------------------
# conv1 path (Cin=3): XLA pre-packs an im2col input so the kernel is a single
# (TH*W, 27) x (27, Cout) matmul per row tile, with fused bias/ReLU/pool.
# ----------------------------------------------------------------------------
def _im2col_3x3(x):
    # x: (N, H, W, C) -> (N, H, W, 9*C); tap order (dy, dx, c) matches
    # w.reshape(9*C, Cout) of an HWIO (3, 3, C, Cout) kernel.
    N, H, W, C = x.shape
    xp = jnp.pad(x, ((0, 0), (1, 1), (1, 1), (0, 0)))
    taps = [xp[:, dy:dy + H, dx:dx + W, :] for dy in range(3) for dx in range(3)]
    return jnp.concatenate(taps, axis=-1)


def _conv_matmul_kernel(x_ref, w_ref, b_ref, o_ref, *, th, W, k, cout, pool):
    # x_ref: (1, th, W, k) im2col rows; w_ref: (k, cout); b_ref: (1, cout)
    patch = x_ref[0].reshape(th * W, k)
    acc = jnp.dot(patch, w_ref[...], preferred_element_type=jnp.float32)
    _bias_relu_pool_store(acc, b_ref, o_ref, th=th, W=W, cout=cout, pool=pool)


def _conv3x3_small_cin(x, w, b, *, pool):
    N, H, W, cin = x.shape
    cout = w.shape[-1]
    th = _pick_block_h(H, W, pool)
    k = 9 * cin
    xk = _im2col_3x3(x)                       # (N, H, W, 9*cin)
    wk = w.reshape(k, cout)
    Ho, Wo = (H // 2, W // 2) if pool else (H, W)
    oth = th // 2 if pool else th

    kernel = functools.partial(_conv_matmul_kernel,
                               th=th, W=W, k=k, cout=cout, pool=pool)
    return pl.pallas_call(
        kernel,
        out_shape=jax.ShapeDtypeStruct((N, Ho, Wo, cout), x.dtype),
        grid_spec=pltpu.PrefetchScalarGridSpec(
            num_scalar_prefetch=0,
            grid=(N, H // th),
            in_specs=[
                pl.BlockSpec((1, th, W, k), lambda n, i: (n, i, 0, 0)),
                pl.BlockSpec((k, cout), lambda n, i: (0, 0)),
                pl.BlockSpec((1, cout), lambda n, i: (0, 0)),
            ],
            out_specs=pl.BlockSpec((1, oth, Wo, cout), lambda n, i: (n, i, 0, 0)),
        ),
        compiler_params=pltpu.CompilerParams(
            dimension_semantics=("parallel", "parallel"),
            vmem_limit_bytes=_VMEM_LIMIT),
    )(xk, wk, b.reshape(1, cout))


# ----------------------------------------------------------------------------
# conv2..4 path (Cin >= 64): padded image resident per batch element, output
# row-tiled; 9 K=Cin MXU matmuls accumulated into a (TH*W, Cout) f32 VMEM
# scratch; fused bias/ReLU/(pool) epilogue.
# ----------------------------------------------------------------------------
def _conv3x3_kernel(x_ref, w_ref, b_ref, o_ref, acc_ref, *, th, W, cin, cout, pool):
    # x_ref: (1, H+2, W+2, cin) padded image; w_ref: (3, 3, cin, cout)
    i = pl.program_id(1)
    row0 = i * th
    for t in range(9):
        dy, dx = t // 3, t % 3
        patch = x_ref[0, pl.ds(row0 + dy, th), pl.ds(dx, W), :].reshape(th * W, cin)
        contrib = jnp.dot(patch, w_ref[dy, dx],
                          preferred_element_type=jnp.float32)
        if t == 0:
            acc_ref[...] = contrib
        else:
            acc_ref[...] += contrib
    _bias_relu_pool_store(acc_ref[...], b_ref, o_ref,
                          th=th, W=W, cout=cout, pool=pool)


def _conv3x3_big_cin(x, w, b, *, pool):
    N, H, W, cin = x.shape
    cout = w.shape[-1]
    th = _pick_block_h(H, W, pool)
    # TODO(synk): the 1-pixel halo is still materialized with a host-side pad;
    # at 224 scale this could be fused into the previous layer's epilogue.
    xp = jnp.pad(x, ((0, 0), (1, 1), (1, 1), (0, 0)))
    Ho, Wo = (H // 2, W // 2) if pool else (H, W)
    oth = th // 2 if pool else th

    kernel = functools.partial(_conv3x3_kernel,
                               th=th, W=W, cin=cin, cout=cout, pool=pool)
    return pl.pallas_call(
        kernel,
        out_shape=jax.ShapeDtypeStruct((N, Ho, Wo, cout), x.dtype),
        grid_spec=pltpu.PrefetchScalarGridSpec(
            num_scalar_prefetch=0,
            grid=(N, H // th),
            in_specs=[
                pl.BlockSpec((1, H + 2, W + 2, cin), lambda n, i: (n, 0, 0, 0)),
                pl.BlockSpec((3, 3, cin, cout), lambda n, i: (0, 0, 0, 0)),
                pl.BlockSpec((1, cout), lambda n, i: (0, 0)),
            ],
            out_specs=pl.BlockSpec((1, oth, Wo, cout), lambda n, i: (n, i, 0, 0)),
            scratch_shapes=[pltpu.VMEM((th * W, cout), jnp.float32)],
        ),
        compiler_params=pltpu.CompilerParams(
            dimension_semantics=("parallel", "parallel"),
            vmem_limit_bytes=_VMEM_LIMIT),
    )(xp, w, b.reshape(1, cout))


def conv3x3(x, w, b, *, pool):
    if x.shape[-1] <= 8:
        return _conv3x3_small_cin(x, w, b, pool=pool)
    return _conv3x3_big_cin(x, w, b, pool=pool)


# ----------------------------------------------------------------------------
# Fused classifier: fc1 (K-tiled, resident f32 accumulator) + ReLU + fc2,
# with a lane-dense (128-wide) padded output written once on the last K step.
# ----------------------------------------------------------------------------
def _classifier_kernel(x_ref, w1_ref, b1_ref, w2_ref, b2_ref, o_ref, acc_ref):
    k = pl.program_id(0)

    @pl.when(k == 0)
    def _():
        acc_ref[...] = jnp.zeros_like(acc_ref)

    acc_ref[...] += jnp.dot(x_ref[...], w1_ref[...],
                            preferred_element_type=jnp.float32)

    @pl.when(k == pl.num_programs(0) - 1)
    def _():
        h = jnp.maximum(acc_ref[...] + b1_ref[...], 0.0)
        # TODO(synk): training-mode Dropout(p=0.5) not implemented; identity at inference.
        out = jnp.dot(h.astype(w2_ref.dtype), w2_ref[...],
                      preferred_element_type=jnp.float32)
        o_ref[...] = (out + b2_ref[...]).astype(o_ref.dtype)


def classifier(x, w1, b1, w2, b2):
    N, F = x.shape
    hidden = w1.shape[1]
    num_classes = w2.shape[1]
    out_pad = ((num_classes + 127) // 128) * 128          # lane-dense output
    w2p = jnp.zeros((hidden, out_pad), w2.dtype).at[:, :num_classes].set(w2)
    b2p = jnp.zeros((1, out_pad), jnp.float32).at[:, :num_classes].set(b2)

    tk = F
    for cand in (2048, 1024, 512, 256, 128):
        if F % cand == 0:
            tk = cand
            break

    out = pl.pallas_call(
        _classifier_kernel,
        out_shape=jax.ShapeDtypeStruct((N, out_pad), jnp.float32),
        grid_spec=pltpu.PrefetchScalarGridSpec(
            num_scalar_prefetch=0,
            grid=(F // tk,),
            in_specs=[
                pl.BlockSpec((N, tk), lambda k: (0, k)),
                pl.BlockSpec((tk, hidden), lambda k: (k, 0)),
                pl.BlockSpec((1, hidden), lambda k: (0, 0)),
                pl.BlockSpec((hidden, out_pad), lambda k: (0, 0)),
                pl.BlockSpec((1, out_pad), lambda k: (0, 0)),
            ],
            out_specs=pl.BlockSpec((N, out_pad), lambda k: (0, 0)),
            scratch_shapes=[pltpu.VMEM((N, hidden), jnp.float32)],
        ),
        compiler_params=pltpu.CompilerParams(
            dimension_semantics=("arbitrary",),
            vmem_limit_bytes=_VMEM_LIMIT),
    )(x, w1, b1.reshape(1, hidden), w2p, b2p)
    return out[:, :num_classes]


# ----------------------------------------------------------------------------
# Full PneumoniaNet forward (inference).
# ----------------------------------------------------------------------------
def pneumonia_net_forward(x_nchw, p):
    x = jnp.transpose(x_nchw, (0, 2, 3, 1)).astype(jnp.bfloat16)   # NCHW -> NHWC, bf16
    x = conv3x3(x, p["conv1_w"], p["conv1_b"], pool=True)          # conv+relu+pool
    x = conv3x3(x, p["conv2_w"], p["conv2_b"], pool=True)          # conv+relu+pool
    x = conv3x3(x, p["conv3_w"], p["conv3_b"], pool=False)         # conv+relu
    x = conv3x3(x, p["conv4_w"], p["conv4_b"], pool=True)          # conv+relu+pool
    x = x.reshape(x.shape[0], -1)                                  # NHWC flatten (fc1_w rows match)
    return classifier(x, p["fc1_w"], p["fc1_b"], p["fc2_w"], p["fc2_b"])


# Pure-JAX reference (same bf16/f32 precision recipe) for a numerical check.
def pneumonia_net_reference(x_nchw, p):
    x = jnp.transpose(x_nchw, (0, 2, 3, 1)).astype(jnp.bfloat16)

    def conv(x, w, b):
        y = jax.lax.conv_general_dilated(
            x, w, (1, 1), "SAME", dimension_numbers=("NHWC", "HWIO", "NHWC"),
            preferred_element_type=jnp.float32)
        return jax.nn.relu(y + b)

    def pool(y):
        return jax.lax.reduce_window(
            y, -jnp.inf, jax.lax.max, (1, 2, 2, 1), (1, 2, 2, 1), "VALID")

    x = pool(conv(x, p["conv1_w"], p["conv1_b"])).astype(jnp.bfloat16)
    x = pool(conv(x, p["conv2_w"], p["conv2_b"])).astype(jnp.bfloat16)
    x = conv(x, p["conv3_w"], p["conv3_b"]).astype(jnp.bfloat16)
    x = pool(conv(x, p["conv4_w"], p["conv4_b"])).astype(jnp.bfloat16)
    x = x.reshape(x.shape[0], -1)
    h = jnp.maximum(
        jnp.dot(x, p["fc1_w"], preferred_element_type=jnp.float32) + p["fc1_b"],
        0.0).astype(jnp.bfloat16)
    return jnp.dot(h, p["fc2_w"], preferred_element_type=jnp.float32) + p["fc2_b"]


def init_params(key, num_classes, hw):
    ks = iter(jax.random.split(key, 12))

    def conv_init(cin, cout):
        w = ((2.0 / (cin * 9)) ** 0.5 *
             jax.random.normal(next(ks), (3, 3, cin, cout), jnp.float32)).astype(jnp.bfloat16)
        b = 0.01 * jax.random.normal(next(ks), (cout,), jnp.float32)
        return w, b

    def lin_init(fin, fout):
        w = ((2.0 / fin) ** 0.5 *
             jax.random.normal(next(ks), (fin, fout), jnp.float32)).astype(jnp.bfloat16)
        b = 0.01 * jax.random.normal(next(ks), (fout,), jnp.float32)
        return w, b

    p = {}
    p["conv1_w"], p["conv1_b"] = conv_init(3, 64)
    p["conv2_w"], p["conv2_b"] = conv_init(64, 128)
    p["conv3_w"], p["conv3_b"] = conv_init(128, 256)
    p["conv4_w"], p["conv4_b"] = conv_init(256, 256)
    fc_in = 256 * (hw // 8) * (hw // 8)          # analogue of 256*28*28 at 224x224
    p["fc1_w"], p["fc1_b"] = lin_init(fc_in, 512)
    p["fc2_w"], p["fc2_b"] = lin_init(512, num_classes)
    return p


if __name__ == "__main__":
    num_classes = 2
    H = W = 32   # downscaled from 224 so the example stays small
    key = jax.random.PRNGKey(0)
    k_in, k_par = jax.random.split(key)
    x = jax.random.normal(k_in, (2, 3, H, W), jnp.float32)   # NCHW, like PyTorch
    params = init_params(k_par, num_classes, H)

    out = jax.block_until_ready(pneumonia_net_forward(x, params))
    assert out.shape == (2, num_classes), out.shape

    ref = jax.block_until_ready(pneumonia_net_reference(x, params))
    if not jnp.allclose(out, ref, rtol=3e-2, atol=3e-2):
        max_err = float(jnp.max(jnp.abs(out - ref)))
        raise AssertionError(
            f"Pallas output does not match JAX reference (max abs err {max_err})")

    print("KERNEL_OK")
</pallas_src>

<mosaic_0001>
module attributes {stable_mosaic.version = 11 : i64} {
  func.func @_conv_matmul_kernel(%arg0: i32, %arg1: i32, %arg2: memref<1x8x32x27xbf16, #tpu.memory_space<vmem>>, %arg3: memref<27x64xbf16, #tpu.memory_space<vmem>>, %arg4: memref<1x64xf32, #tpu.memory_space<vmem>>, %arg5: memref<1x4x16x64xbf16, #tpu.memory_space<vmem>>) attributes {dimension_semantics = [#tpu.dimension_semantics<parallel>, #tpu.dimension_semantics<parallel>], iteration_bounds = array<i64: 2, 4>, scalar_prefetch = 0 : i64, scratch_operands = 0 : i64, tpu.core_type = #tpu.core_type<tc>, window_params = [{transform_indices = @transform_0, window_bounds = array<i64: 1, 8, 32, 27>}, {pipeline_mode = #tpu.pipeline_mode<synchronous>, transform_indices = @transform_1, window_bounds = array<i64: 27, 64>}, {pipeline_mode = #tpu.pipeline_mode<synchronous>, transform_indices = @transform_2, window_bounds = array<i64: 1, 64>}, {transform_indices = @transform_3, window_bounds = array<i64: 1, 4, 16, 64>}]} {
    %c0 = arith.constant 0 : index
    %c0_0 = arith.constant 0 : index
    %c0_1 = arith.constant 0 : index
    %c0_2 = arith.constant 0 : index
    %0 = vector.load %arg2[%c0, %c0_0, %c0_1, %c0_2] : memref<1x8x32x27xbf16, #tpu.memory_space<vmem>>, vector<1x8x32x27xbf16>
    %1 = vector.shape_cast %0 : vector<1x8x32x27xbf16> to vector<8x32x27xbf16>
    %2 = vector.shape_cast %1 : vector<8x32x27xbf16> to vector<256x27xbf16>
    %c0_3 = arith.constant 0 : index
    %c0_4 = arith.constant 0 : index
    %3 = vector.load %arg3[%c0_3, %c0_4] : memref<27x64xbf16, #tpu.memory_space<vmem>>, vector<27x64xbf16>
    %cst = arith.constant dense<0.000000e+00> : vector<256x64xf32>
    %4 = tpu.matmul %2, %3, %cst {dimension_numbers = #tpu.dot_dimension_numbers<[1], [0], [0], [1], [0, 0, 1, 1], [], []>} : vector<256x27xbf16>, vector<27x64xbf16>, vector<256x64xf32> -> vector<256x64xf32>
    %c0_5 = arith.constant 0 : index
    %c0_6 = arith.constant 0 : index
    %5 = vector.load %arg4[%c0_5, %c0_6] : memref<1x64xf32, #tpu.memory_space<vmem>>, vector<1x64xf32>
    %6 = vector.broadcast %5 : vector<1x64xf32> to vector<256x64xf32>
    %7 = arith.addf %4, %6 : vector<256x64xf32>
    %cst_7 = arith.constant 0.000000e+00 : f32
    %8 = vector.broadcast %cst_7 : f32 to vector<256x64xf32>
    %9 = arith.maximumf %7, %8 : vector<256x64xf32>
    %10 = vector.shape_cast %9 : vector<256x64xf32> to vector<8x32x64xf32>
    %11 = vector.shape_cast %10 : vector<8x32x64xf32> to vector<4x2x32x64xf32>
    %12 = vector.extract_strided_slice %11 {offsets = [0, 0, 0, 0], sizes = [4, 1, 32, 64], strides = [1, 1, 1, 1]} : vector<4x2x32x64xf32> to vector<4x1x32x64xf32>
    %13 = vector.shape_cast %12 : vector<4x1x32x64xf32> to vector<4x32x64xf32>
    %14 = vector.extract_strided_slice %11 {offsets = [0, 1, 0, 0], sizes = [4, 1, 32, 64], strides = [1, 1, 1, 1]} : vector<4x2x32x64xf32> to vector<4x1x32x64xf32>
    %15 = vector.shape_cast %14 : vector<4x1x32x64xf32> to vector<4x32x64xf32>
    %16 = arith.maximumf %13, %15 : vector<4x32x64xf32>
    %17 = vector.extract_strided_slice %16 {offsets = [0, 0, 0], sizes = [4, 1, 64], strides = [1, 1, 1]} : vector<4x32x64xf32> to vector<4x1x64xf32>
    %18 = vector.extract_strided_slice %16 {offsets = [0, 1, 0], sizes = [4, 1, 64], strides = [1, 1, 1]} : vector<4x32x64xf32> to vector<4x1x64xf32>
    %19 = arith.maximumf %17, %18 : vector<4x1x64xf32>
    %20 = vector.extract_strided_slice %16 {offsets = [0, 2, 0], sizes = [4, 1, 64], strides = [1, 1, 1]} : vector<4x32x64xf32> to vector<4x1x64xf32>
    %21 = vector.extract_strided_slice %16 {offsets = [0, 3, 0], sizes = [4, 1, 64], strides = [1, 1, 1]} : vector<4x32x64xf32> to vector<4x1x64xf32>
    %22 = arith.maximumf %20, %21 : vector<4x1x64xf32>
    %23 = vector.extract_strided_slice %16 {offsets = [0, 4, 0], sizes = [4, 1, 64], strides = [1, 1, 1]} : vector<4x32x64xf32> to vector<4x1x64xf32>
    %24 = vector.extract_strided_slice %16 {offsets = [0, 5, 0], sizes = [4, 1, 64], strides = [1, 1, 1]} : vector<4x32x64xf32> to vector<4x1x64xf32>
    %25 = arith.maximumf %23, %24 : vector<4x1x64xf32>
    %26 = vector.extract_strided_slice %16 {offsets = [0, 6, 0], sizes = [4, 1, 64], strides = [1, 1, 1]} : vector<4x32x64xf32> to vector<4x1x64xf32>
    %27 = vector.extract_strided_slice %16 {offsets = [0, 7, 0], sizes = [4, 1, 64], strides = [1, 1, 1]} : vector<4x32x64xf32> to vector<4x1x64xf32>
    %28 = arith.maximumf %26, %27 : vector<4x1x64xf32>
    %29 = vector.extract_strided_slice %16 {offsets = [0, 8, 0], sizes = [4, 1, 64], strides = [1, 1, 1]} : vector<4x32x64xf32> to vector<4x1x64xf32>
    %30 = vector.extract_strided_slice %16 {offsets = [0, 9, 0], sizes = [4, 1, 64], strides = [1, 1, 1]} : vector<4x32x64xf32> to vector<4x1x64xf32>
    %31 = arith.maximumf %29, %30 : vector<4x1x64xf32>
    %32 = vector.extract_strided_slice %16 {offsets = [0, 10, 0], sizes = [4, 1, 64], strides = [1, 1, 1]} : vector<4x32x64xf32> to vector<4x1x64xf32>
    %33 = vector.extract_strided_slice %16 {offsets = [0, 11, 0], sizes = [4, 1, 64], strides = [1, 1, 1]} : vector<4x32x64xf32> to vector<4x1x64xf32>
    %34 = arith.maximumf %32, %33 : vector<4x1x64xf32>
    %35 = vector.extract_strided_slice %16 {offsets = [0, 12, 0], sizes = [4, 1, 64], strides = [1, 1, 1]} : vector<4x32x64xf32> to vector<4x1x64xf32>
    %36 = vector.extract_strided_slice %16 {offsets = [0, 13, 0], sizes = [4, 1, 64], strides = [1, 1, 1]} : vector<4x32x64xf32> to vector<4x1x64xf32>
    %37 = arith.maximumf %35, %36 : vector<4x1x64xf32>
    %38 = vector.extract_strided_slice %16 {offsets = [0, 14, 0], sizes = [4, 1, 64], strides = [1, 1, 1]} : vector<4x32x64xf32> to vector<4x1x64xf32>
    %39 = vector.extract_strided_slice %16 {offsets = [0, 15, 0], sizes = [4, 1, 64], strides = [1, 1, 1]} : vector<4x32x64xf32> to vector<4x1x64xf32>
    %40 = arith.maximumf %38, %39 : vector<4x1x64xf32>
    %41 = vector.extract_strided_slice %16 {offsets = [0, 16, 0], sizes = [4, 1, 64], strides = [1, 1, 1]} : vector<4x32x64xf32> to vector<4x1x64xf32>
    %42 = vector.extract_strided_slice %16 {offsets = [0, 17, 0], sizes = [4, 1, 64], strides = [1, 1, 1]} : vector<4x32x64xf32> to vector<4x1x64xf32>
    %43 = arith.maximumf %41, %42 : vector<4x1x64xf32>
    %44 = vector.extract_strided_slice %16 {offsets = [0, 18, 0], sizes = [4, 1, 64], strides = [1, 1, 1]} : vector<4x32x64xf32> to vector<4x1x64xf32>
    %45 = vector.extract_strided_slice %16 {offsets = [0, 19, 0], sizes = [4, 1, 64], strides = [1, 1, 1]} : vector<4x32x64xf32> to vector<4x1x64xf32>
    %46 = arith.maximumf %44, %45 : vector<4x1x64xf32>
    %47 = vector.extract_strided_slice %16 {offsets = [0, 20, 0], sizes = [4, 1, 64], strides = [1, 1, 1]} : vector<4x32x64xf32> to vector<4x1x64xf32>
    %48 = vector.extract_strided_slice %16 {offsets = [0, 21, 0], sizes = [4, 1, 64], strides = [1, 1, 1]} : vector<4x32x64xf32> to vector<4x1x64xf32>
    %49 = arith.maximumf %47, %48 : vector<4x1x64xf32>
    %50 = vector.extract_strided_slice %16 {offsets = [0, 22, 0], sizes = [4, 1, 64], strides = [1, 1, 1]} : vector<4x32x64xf32> to vector<4x1x64xf32>
    %51 = vector.extract_strided_slice %16 {offsets = [0, 23, 0], sizes = [4, 1, 64], strides = [1, 1, 1]} : vector<4x32x64xf32> to vector<4x1x64xf32>
    %52 = arith.maximumf %50, %51 : vector<4x1x64xf32>
    %53 = vector.extract_strided_slice %16 {offsets = [0, 24, 0], sizes = [4, 1, 64], strides = [1, 1, 1]} : vector<4x32x64xf32> to vector<4x1x64xf32>
    %54 = vector.extract_strided_slice %16 {offsets = [0, 25, 0], sizes = [4, 1, 64], strides = [1, 1, 1]} : vector<4x32x64xf32> to vector<4x1x64xf32>
    %55 = arith.maximumf %53, %54 : vector<4x1x64xf32>
    %56 = vector.extract_strided_slice %16 {offsets = [0, 26, 0], sizes = [4, 1, 64], strides = [1, 1, 1]} : vector<4x32x64xf32> to vector<4x1x64xf32>
    %57 = vector.extract_strided_slice %16 {offsets = [0, 27, 0], sizes = [4, 1, 64], strides = [1, 1, 1]} : vector<4x32x64xf32> to vector<4x1x64xf32>
    %58 = arith.maximumf %56, %57 : vector<4x1x64xf32>
    %59 = vector.extract_strided_slice %16 {offsets = [0, 28, 0], sizes = [4, 1, 64], strides = [1, 1, 1]} : vector<4x32x64xf32> to vector<4x1x64xf32>
    %60 = vector.extract_strided_slice %16 {offsets = [0, 29, 0], sizes = [4, 1, 64], strides = [1, 1, 1]} : vector<4x32x64xf32> to vector<4x1x64xf32>
    %61 = arith.maximumf %59, %60 : vector<4x1x64xf32>
    %62 = vector.extract_strided_slice %16 {offsets = [0, 30, 0], sizes = [4, 1, 64], strides = [1, 1, 1]} : vector<4x32x64xf32> to vector<4x1x64xf32>
    %63 = vector.extract_strided_slice %16 {offsets = [0, 31, 0], sizes = [4, 1, 64], strides = [1, 1, 1]} : vector<4x32x64xf32> to vector<4x1x64xf32>
    %64 = arith.maximumf %62, %63 : vector<4x1x64xf32>
    %65 = tpu.concatenate %19, %22, %25, %28, %31, %34, %37, %40, %43, %46, %49, %52, %55, %58, %61, %64 in 1 : vector<4x1x64xf32>, vector<4x1x64xf32>, vector<4x1x64xf32>, vector<4x1x64xf32>, vector<4x1x64xf32>, vector<4x1x64xf32>, vector<4x1x64xf32>, vector<4x1x64xf32>, vector<4x1x64xf32>, vector<4x1x64xf32>, vector<4x1x64xf32>, vector<4x1x64xf32>, vector<4x1x64xf32>, vector<4x1x64xf32>, vector<4x1x64xf32>, vector<4x1x64xf32> -> vector<4x16x64xf32>
    %66 = arith.truncf %65 : vector<4x16x64xf32> to vector<4x16x64xbf16>
    %c0_8 = arith.constant 0 : index
    %c0_9 = arith.constant 0 : index
    %c0_10 = arith.constant 0 : index
    %c0_11 = arith.constant 0 : index
    %67 = vector.load %arg5[%c0_8, %c0_9, %c0_10, %c0_11] : memref<1x4x16x64xbf16, #tpu.memory_space<vmem>>, vector<1x4x16x64xbf16>
    %68 = vector.shape_cast %67 : vector<1x4x16x64xbf16> to vector<4x16x64xbf16>
    %69 = vector.shape_cast %66 : vector<4x16x64xbf16> to vector<1x4x16x64xbf16>
    tpu.vector_store %arg5[%c0_8, %c0_9, %c0_10, %c0_11], %69 {strides = array<i32>} : memref<1x4x16x64xbf16, #tpu.memory_space<vmem>>, vector<1x4x16x64xbf16>,
    return
  }
  func.func @transform_0(%arg0: i32, %arg1: i32) -> (i32, i32, i32, i32) {
    %c0_i32 = arith.constant 0 : i32
    %c0_i32_0 = arith.constant 0 : i32
    %c0_i32_1 = arith.constant 0 : i32
    return %arg0, %arg1, %c0_i32, %c0_i32_0 : i32, i32, i32, i32
  }
  func.func @transform_1(%arg0: i32, %arg1: i32) -> (i32, i32) {
    %c0_i32 = arith.constant 0 : i32
    %c0_i32_0 = arith.constant 0 : i32
    %c0_i32_1 = arith.constant 0 : i32
    return %c0_i32, %c0_i32_0 : i32, i32
  }
  func.func @transform_2(%arg0: i32, %arg1: i32) -> (i32, i32) {
    %c0_i32 = arith.constant 0 : i32
    %c0_i32_0 = arith.constant 0 : i32
    %c0_i32_1 = arith.constant 0 : i32
    return %c0_i32, %c0_i32_0 : i32, i32
  }
  func.func @transform_3(%arg0: i32, %arg1: i32) -> (i32, i32, i32, i32) {
    %c0_i32 = arith.constant 0 : i32
    %c0_i32_0 = arith.constant 0 : i32
    %c0_i32_1 = arith.constant 0 : i32
    return %arg0, %arg1, %c0_i32, %c0_i32_0 : i32, i32, i32, i32
  }
}

</mosaic_0001>

<bundles_post_ra>
// kernel: tpu_custom_call.1
= control target key start
LH: loop header
LB: loop body
LE: loop exit
PB: predicated region body
PF: predicated region fallthrough
CT: control target
= control target key end

     0   :  { %8 = vsyncpa [#allocation3], 0  ;;  %s1685_s0 = inlined_call_operand.vmem [shape: bf16[2,32,32,27], index: 0, kind: input, shape index: {}]   ;;  %s1686_s1 = inlined_call_operand.vmem [shape: bf16[27,64], index: 1, kind: input, shape index: {}]   ;;  %s1687_s2 = inlined_call_operand.vmem [shape: f32[1,64], index: 2, kind: input, shape index: {}]   ;;  %s1688_s3 = inlined_call_operand.hbm [shape: bf16[2,16,16,64], index: 3, kind: output, shape index: {}]  }
   0x1   :  { %10 = vsyncpa [#allocation3 + $0x1], 0  ;;  %s1338_s12 = smov 0   ;;  %s1340_s13 = smov 0  }
   0x2   :  { %s1342_s14 = smov 0   ;;  %s1344_s15 = smov 0  }
   0x3   :  { %s1346_s16 = smov 0   ;;  %s1348_s17 = smov 0  }
   0x4   :  { %s1350_s18 = smov 0   ;;  %s1352_s19 = smov 0  }
   0x5 LB: > { %s999_s20 = sadd.s32 4294967295, %s1312_s19   ;;  %s1000_s21 = sadd.s32 4294967294, %s1312_s19   ;;  %s1312_s19 = sphi %s1352_s19, %s16_s19   ;;  %s1308_s18 = sphi %s1350_s18, %s1697_s18   ;;  %s1304_s17 = sphi %s1348_s17, %s1696_s17   ;;  %s1300_s16 = sphi %s1346_s16, %s1695_s16   ;;  %s1296_s15 = sphi %s1344_s15, %s1694_s15   ;;  %s1292_s14 = sphi %s1342_s14, %s1693_s14   ;;  %s1288_s13 = sphi %s1340_s13, %s1692_s13   ;;  %s1284_s12 = sphi %s1338_s12, %s1691_s12  }
   0x6   : > { %s25_s22 = sadd.s32 1, %s1304_s17  ;;  %s28_s23 = sadd.s32 1, %s1308_s18 }
   0x7   : > { %p26_p0 = scmp.ge.s32.totalorder %s25_s22, 4  ;;  %p117_p1 = scmp.ne.s32.totalorder %s1292_s14, %s1288_s13 }
   0x8   : > { %p118_p2 = scmp.eq.s32.totalorder %s999_s20, 7  ;;  %p123_p5 = scmp.ne.s32.totalorder %s1288_s13, %s1284_s12 }
   0x9   : > { %s1699_s22 = smov (%p26_p0, %s25_s22), 0  ;;  %s1701_s23 = smov (!%p26_p0, %s28_s23), %s1308_s18 }
   0xa   : > { %s103_s24 = ssub.s32 %s1304_s17, %s1699_s22  ;;  %p1389_p3 = por %p118_p2, %p117_p1 }
   0xb   : > { %p30_p4 = scmp.ge.s32.totalorder %s1701_s23, 2  ;;  %p124_p6 = scmp.eq.s32.totalorder %s1000_s21, 7 }
   0xc   : > { %p1003_p7 = scmp.ge.s32.totalorder %s1312_s19, 1  ;;  %p162_p9 = scmp.lt.s32.totalorder %s1312_s19, 9 }
   0xd   : > { %s1703_s23 = smov (%p30_p4, %s1701_s23), 0  ;;  %p1398_p8 = por %p124_p6, %p123_p5 }
   0xe   : > { %s102_s27 = ssub.s32 %s1308_s18, %s1703_s23  ;;  %s107_s28 = sadd.s32 1, %s1292_s14 }
   0xf   : > { %s104_s29 = sor.u32 %s103_s24, %s102_s27  ;;  %p163_p10 = pnand %p1003_p7, %p162_p9 }
  0x10   : > { %p105_p11 = scmp.eq.s32.totalorder %s104_s29, 0  ;;  %v1200_v0 = vld [vmem:[%s1686_s1] sm:$0xff] (!%p163_p10)   ;;  %vm387_vm0 = vcmask (!%p163_p10), 1044480   ;;  %v1201_v1 = vld [vmem:[%s1686_s1 + $0x8] sm:$0x3f] (!%p163_p10)   ;;  %vm388_vm1 = vcmask (!%p163_p10), 1045504  }
  0x11   : > { %166 = sbr.rel (%p163_p10) target bundleno = 330 (0x14a), region = 32  ;;  %1086 = vmatprep.subr.bf16.mxu0 (!%p163_p10), %v1200_v0  ;;  %1122 = vmatprep.subr.bf16.mxu1 (!%p163_p10), %v1200_v0  ;;  %s1416_s8 = sshll.u32 (!%p163_p10), %s1296_s15, 3  ;;  %v1314_v2 = vmov (!%p163_p10), 65535   ;;  %vm338_vm2 = vcmask (!%p163_p10), 220160   ;;  %v1464_v23 = vld [vmem:[%s1687_s2] ss:$0 sm:$0xff] (!%p163_p10) }
  0x12   : > { %s1407_s30 = scalar_select %p105_p11, %s1292_s14, %s107_s28  }
  0x13   : > { %p192_p12 = scmp.lt.s32.totalorder (!%p163_p10), %s1300_s16, 1  ;;  %1087 = vmatpush3.bf16.msra.mxu0 (!%p163_p10), %v1200_v0  ;;  %1124 = vmatpush3.bf16.msra.mxu1 (!%p163_p10), %v1200_v0  ;;  %v389_v3 = vsel (!%p163_p10), %vm387_vm0, 4294967295, %v1314_v2  ;;  %p194_p13 = scmp.lt.s32.totalorder (!%p163_p10), %s1416_s8, 31  ;;  %vm795_vm3 = vcmask (!%p163_p10), 1040384   ;;  %vm800_vm4 = vcmask (!%p163_p10), 1041408   ;;  %vm805_vm5 = vcmask (!%p163_p10), 1042432  }
  0x14   : > { %v390_v4 = vsel (!%p163_p10), %vm388_vm1, %v389_v3, 0  ;;  %vm810_vm6 = vcmask (!%p163_p10), 1043456   ;;  %vm823_vm7 = vcmask (!%p163_p10), 1046528   ;;  %vm888_vm8 = vcmask (!%p163_p10), 519168   ;;  %s188_s5 = sand.u32 (!%p163_p10), 1, %s1288_s13   ;;  %s1315_s27 = smov (!%p163_p10), [#allocation2]  }
  0x15   : > { %v392_v5 = vand.u32 (!%p163_p10), %v1201_v1, %v390_v4  ;;  %s1004_s6 = sshll.u32 (!%p163_p10), %s188_s5, 5 }
  0x16   : > { %s1543_s7 = scalar_lea.vmem (!%p163_p10), [#allocation2], %s1004_s6 }
  0x17   : > { %1088 = vmatprep.subr.bf16.mxu0 (!%p163_p10), %v392_v5  ;;  %1123 = vmatprep.subr.bf16.mxu1 (!%p163_p10), %v392_v5 }
  0x18   : > { %s193_s9 = scalar_select %p192_p12, %s1300_s16, 1  ;;  %1089 = vmatpush3.bf16.msra.mxu0 %v392_v5  ;;  %1125 = vmatpush3.bf16.msra.mxu1 %v392_v5 }
  0x19   : > { %s195_s10 = scalar_select %p194_p13, %s1416_s8, 31 }
  0x1a   : > { %s1007_s11 = sshll.u32 %s193_s9, 7  ;;  %s1055_s9 = sshll.u32 %s1300_s16, 5 }
  0x1b   : > { %s1006_s20 = sshll.u32 %s195_s10, 2  ;;  %s911_s10 = sadd.s32 %s1055_s9, %s1416_s8 }
  0x1c   : > { %s198_s15 = sadd.s32 %s1007_s11, %s1006_s20  ;;  %s1056_s16 = sshll.u32 %s911_s10, 6 }
  0x1d   : > { %s1008_s21 = sshll.u32 %s198_s15, 2  ;;  %s914_s11 = sshll.u32 %s1543_s7, 4  ;;  %s1627_s11 = int_to_ptr.vmem [resolvable:$true] %s914_s11 }
  0x1e   : > { %s1427_s28 = scalar_lea.vmem %s1685_s0, %s1008_s21  ;;  %s1625_s15 = scalar_lea.hbm %s1688_s3, %s1056_s16 }
  0x1f   : > { %v1202_v6 = vld [vmem:[%s1427_s28] sm:$0xff]   ;;  %v1204_v8 = vld [vmem:[%s1427_s28 + $0x8] sm:$0xff]   ;;  %v1206_v10 = vld [vmem:[%s1427_s28 + $0x10] sm:$0xff]   ;;  %s1633_s21 = scalar_lea.sflag [#allocation3], %s188_s5  ;;  %s1218_s24 = scalar_lea.vmem %s1627_s11, 512 }
  0x20   : > { %v1203_v7 = vld [vmem:[%s1427_s28 + $0x40] sm:$0xff]   ;;  %1090 = vmatprep.mubr.msk.bf16.mxu0 %vm338_vm2, %v1202_v6  ;;  %v1205_v9 = vld [vmem:[%s1427_s28 + $0x48] sm:$0xff]   ;;  %v1207_v11 = vld [vmem:[%s1427_s28 + $0x50] sm:$0xff]   ;;  %p1219_p0 = scmp.ne.s32.totalorder %s1627_s11, %s1218_s24 }
  0x21   : > { %1106 = vmatprep.mubr.msk.bf16.mxu1 %vm338_vm2, %v1203_v7  ;;  %1091 = vmatmul.mubr.msk.bf16.vlgmr.msra.gmra.mrb[0].mxu0 %vm338_vm2, %v1204_v8  ;;  %v1208_v12 = vld [vmem:[%s1427_s28 + $0x18] sm:$0xff]   ;;  %v1210_v14 = vld [vmem:[%s1427_s28 + $0x20] sm:$0xff]   ;;  %v1212_v16 = vld [vmem:[%s1427_s28 + $0x28] sm:$0xff]  }
  0x22   : > { %1107 = vmatmul.mubr.msk.bf16.vlgmr.msra.gmra.mrb[0].mxu1 %vm338_vm2, %v1205_v9  ;;  %1094 = vmatprep.mubr.msk.bf16.mxu0 %vm338_vm2, %v1206_v10  ;;  %v1209_v13 = vld [vmem:[%s1427_s28 + $0x58] sm:$0xff]   ;;  %v1211_v15 = vld [vmem:[%s1427_s28 + $0x60] sm:$0xff]   ;;  %v1213_v17 = vld [vmem:[%s1427_s28 + $0x68] sm:$0xff]   ;;  %p1220_p1 = pnand %p1219_p0, %p1389_p3 }
  0x23   : > { %1110 = vmatprep.mubr.msk.bf16.mxu1 %vm338_vm2, %v1207_v11  ;;  %v1214_v18 = vld [vmem:[%s1427_s28 + $0x30] sm:$0xff]   ;;  %v1216_v20 = vld [vmem:[%s1427_s28 + $0x38] sm:$0xff]  }
  0x24   : > { %v1215_v19 = vld [vmem:[%s1427_s28 + $0x70] sm:$0xff]   ;;  %v1217_v21 = vld [vmem:[%s1427_s28 + $0x78] sm:$0xff]   ;;  %p1221_p2 = pneg %p1220_p1  ;;  %s1222_s28 = sshll.u32 %s1315_s27, 4  ;;  %s1223_s28 = int_to_ptr.vmem [resolvable:$false] %s1222_s28 }
  0x25   : > { %s1224_s29 = scalar_lea.vmem %s1223_s28, 1024  ;;  %p1225_p4 = scmp.lt.s32.totalorder %s1627_s11, %s1223_s28 }
  0x26   : > { %p1226_p5 = scmp.lt.s32.totalorder %s1224_s29, %s1218_s24 }
  0x28   : > { %p1227_p6 = por %p1226_p5, %p1225_p4 }
  0x29   : > { %1095 = vmatmul.mubr.msk.bf16.gmra.mrb[4].mxu0 %vm338_vm2, %v1208_v12 }
  0x2a   : > { %1111 = vmatmul.mubr.msk.bf16.gmra.mrb[4].mxu1 %vm338_vm2, %v1209_v13  ;;  %1098 = vmatprep.mubr.msk.bf16.mxu0 %vm338_vm2, %v1210_v14  ;;  %p1228_p7 = pnand %p1227_p6, %p1221_p2 }
  0x2b   : > { %1114 = vmatprep.mubr.msk.bf16.mxu1 %vm338_vm2, %v1211_v15 }
  0x31   : > { %1099 = vmatmul.mubr.msk.bf16.gmra.mrb[8].mxu0 %vm338_vm2, %v1212_v16 }
  0x32   : > { %1115 = vmatmul.mubr.msk.bf16.gmra.mrb[8].mxu1 %vm338_vm2, %v1213_v17  ;;  %1102 = vmatprep.mubr.msk.bf16.mxu0 %vm338_vm2, %v1214_v18 }
  0x33   : > { %1118 = vmatprep.mubr.msk.bf16.mxu1 %vm338_vm2, %v1215_v19 }
  0x39   : > { %1103 = vmatmul.mubr.msk.bf16.gmra.mrb[12].mxu0 %vm338_vm2, %v1216_v20 }
  0x3a   : > { %1119 = vmatmul.mubr.msk.bf16.gmra.mrb[12].mxu1 %vm338_vm2, %v1217_v21 }
  0xf4   : > { %v1092_v22 = vpop.f32.mrb[0].mxu0 }
  0xf5   : > { %v1108_v24 = vpop.f32.mrb[0].mxu1  ;;  %v428_v25 = vpop.f32.mrb[1].mxu0  ;;  %v437_v30 = vadd.f32 %v1092_v22, %v1464_v23 }
  0xf6   : > { %v492_v26 = vpop.f32.mrb[1].mxu1  ;;  %v1093_v27 = vpop.f32.mrb[2].mxu0  ;;  %v501_v31 = vadd.f32 %v1108_v24, %v1464_v23  ;;  %v429_v33 = vadd.f32 %v1464_v23, %v428_v25 }
  0xf7   : > { %v1109_v28 = vpop.f32.mrb[2].mxu1  ;;  %v431_v29 = vpop.f32.mrb[3].mxu0  ;;  %v493_v34 = vadd.f32 %v1464_v23, %v492_v26  ;;  %v440_v35 = vadd.f32 %v1093_v27, %v1464_v23  ;;  %v557_v39 = vmax.f32 %v437_v30, 0.0 }
  0xf8   : > { %v495_v32 = vpop.f32.mrb[3].mxu1  ;;  %v504_v36 = vadd.f32 %v1109_v28, %v1464_v23  ;;  %v432_v37 = vadd.f32 %v1464_v23, %v431_v29  ;;  %v573_v40 = vmax.f32 %v501_v31, 0.0  ;;  %v555_v42 = vmax.f32 %v429_v33, 0.0 }
  0xf9   : > { %v496_v38 = vadd.f32 %v1464_v23, %v495_v32  ;;  %v571_v43 = vmax.f32 %v493_v34, 0.0  ;;  %v558_v44 = vmax.f32 %v440_v35, 0.0 }
  0xfa   : > { %v574_v48 = vmax.f32 %v504_v36, 0.0  ;;  %v556_v49 = vmax.f32 %v432_v37, 0.0 }
  0xfb   : > { %v572_v54 = vmax.f32 %v496_v38, 0.0 }
  0xfc   : > { %v1096_v41 = vpop.f32.mrb[4].mxu0 }
  0xfd   : > { %v453_v45 = vadd.f32 %v1096_v41, %v1464_v23  ;;  %v1112_v46 = vpop.f32.mrb[4].mxu1  ;;  %v444_v47 = vpop.f32.mrb[5].mxu0 }
  0xfe   : > { %v517_v50 = vadd.f32 %v1112_v46, %v1464_v23  ;;  %v445_v51 = vadd.f32 %v1464_v23, %v444_v47  ;;  %v508_v52 = vpop.f32.mrb[5].mxu1  ;;  %v1097_v53 = vpop.f32.mrb[6].mxu0 }
  0xff   : > { %v561_v55 = vmax.f32 %v453_v45, 0.0  ;;  %v509_v56 = vadd.f32 %v1464_v23, %v508_v52  ;;  %v456_v57 = vadd.f32 %v1097_v53, %v1464_v23  ;;  %v1113_v58 = vpop.f32.mrb[6].mxu1  ;;  %v447_v59 = vpop.f32.mrb[7].mxu0 }
 0x100   : > { %v577_v60 = vmax.f32 %v517_v50, 0.0  ;;  %v559_v61 = vmax.f32 %v445_v51, 0.0  ;;  %v520_v62 = vadd.f32 %v1113_v58, %v1464_v23  ;;  %v448_v63 = vadd.f32 %v1464_v23, %v447_v59  ;;  %v511_v0 = vpop.f32.mrb[7].mxu1 }
 0x101   : > { %v589_v1 = vmax.f32 %v557_v39, %v561_v55  ;;  %v575_v2 = vmax.f32 %v509_v56, 0.0  ;;  %v562_v3 = vmax.f32 %v456_v57, 0.0  ;;  %v512_v4 = vadd.f32 %v1464_v23, %v511_v0 }
 0x102   : > { %v597_v5 = vmax.f32 %v573_v40, %v577_v60  ;;  %v587_v6 = vmax.f32 %v555_v42, %v559_v61  ;;  %v578_v7 = vmax.f32 %v520_v62, 0.0  ;;  %v560_v8 = vmax.f32 %v448_v63, 0.0 }
 0x103   : > { %v639_v9 = vrot.slane %v589_v1, 1  ;;  %v595_v10 = vmax.f32 %v571_v43, %v575_v2  ;;  %v590_v11 = vmax.f32 %v558_v44, %v562_v3  ;;  %v576_v12 = vmax.f32 %v512_v4, 0.0 }
 0x104   : > { %v641_v13 = vrot.slane %v597_v5, 1  ;;  %v607_v14 = vrot.slane %v587_v6, 1  ;;  %v598_v15 = vmax.f32 %v574_v48, %v578_v7  ;;  %v588_v16 = vmax.f32 %v556_v49, %v560_v8  ;;  %v1482_v17 = vpop.f32.mrb[8].mxu0 }
 0x105   : > { %v647_v18 = vmax.f32 %v589_v1, %v639_v9  ;;  %v609_v19 = vrot.slane %v595_v10, 1  ;;  %v655_v20 = vrot.slane %v590_v11, 1  ;;  %v1484_v21 = vmax.f32 %v572_v54, %v576_v12  ;;  %v1486_v22 = vpop.f32.mrb[8].mxu1  ;;  %v1488_v24 = vpop.f32.mrb[9].mxu0 }
 0x106   : > { %v649_v25 = vmax.f32 %v597_v5, %v641_v13  ;;  %v615_v26 = vmax.f32 %v587_v6, %v607_v14  ;;  %v657_v27 = vrot.slane %v598_v15, 1  ;;  %v623_v28 = vrot.slane %v588_v16, 1  ;;  %v1490_v29 = vpop.f32.mrb[9].mxu1  ;;  %v1492_v30 = vpop.f32.mrb[10].mxu0 }
 0x107   : > { %v735_v31 = vrot.slane %v647_v18, 1  ;;  %v743_v32 = vrot.slane %v647_v18, 2  ;;  %v751_v33 = vrot.slane %v647_v18, 3  ;;  %v617_v34 = vmax.f32 %v595_v10, %v609_v19  ;;  %v1494_v35 = vpop.f32.mrb[10].mxu1  ;;  %v1496_v36 = vpop.f32.mrb[11].mxu0 }
 0x108   : > { %v737_v37 = vrot.slane %v649_v25, 1  ;;  %v745_v38 = vrot.slane %v649_v25, 2  ;;  %v753_v39 = vrot.slane %v649_v25, 3  ;;  %v671_v40 = vrot.slane %v615_v26, 1  ;;  %v1498_v41 = vpop.f32.mrb[11].mxu1 }
 0x109   : > { %v828_v42 = vsel %vm795_vm3, %v647_v18, %v735_v31  ;;  %v679_v43 = vrot.slane %v615_v26, 2  ;;  %v687_v44 = vrot.slane %v615_v26, 3  ;;  %v673_v45 = vrot.slane %v617_v34, 1 }
 0x10a   : > { %v832_v46 = vsel %vm800_vm4, %v828_v42, %v743_v32  ;;  %v830_v47 = vsel %vm795_vm3, %v649_v25, %v737_v37  ;;  %v796_v48 = vsel %vm795_vm3, %v615_v26, %v671_v40  ;;  %v681_v49 = vrot.slane %v617_v34, 2 }
 0x10b   : > { %v836_v50 = vsel %vm805_vm5, %v832_v46, %v751_v33  ;;  %v834_v51 = vsel %vm800_vm4, %v830_v47, %v745_v38  ;;  %v801_v52 = vsel %vm800_vm4, %v796_v48, %v679_v43  ;;  %v689_v53 = vrot.slane %v617_v34, 3 }
 0x10c   : > { %v838_v54 = vsel %vm805_vm5, %v834_v51, %v753_v39  ;;  %v806_v55 = vsel %vm805_vm5, %v801_v52, %v687_v44  ;;  %v798_v56 = vsel %vm795_vm3, %v617_v34, %v673_v45  ;;  %v663_v57 = vmax.f32 %v590_v11, %v655_v20  ;;  %v1510_v58 = vpop.f32.mrb[12].mxu0 }
 0x10d   : > { %v803_v59 = vsel %vm800_vm4, %v798_v56, %v681_v49  ;;  %v665_v60 = vmax.f32 %v598_v15, %v657_v27  ;;  %v631_v61 = vmax.f32 %v588_v16, %v623_v28  ;;  %v625_v62 = vrot.slane %v1484_v21, 1  ;;  %v1515_v63 = vpop.f32.mrb[12].mxu1  ;;  %v1517_v0 = vpop.f32.mrb[13].mxu0 }
 0x10e   : > { %v808_v1 = vsel %vm805_vm5, %v803_v59, %v689_v53  ;;  %v763_v2 = vrot.slane %v663_v57, 4  ;;  %v771_v3 = vrot.slane %v663_v57, 5  ;;  %v779_v4 = vrot.slane %v663_v57, 6  ;;  %v1520_v5 = vpop.f32.mrb[13].mxu1  ;;  %v1522_v6 = vpop.f32.mrb[14].mxu0 }
 0x10f   : > { %v787_v7 = vrot.slane %v663_v57, 7  ;;  %v765_v8 = vrot.slane %v665_v60, 4  ;;  %v773_v9 = vrot.slane %v665_v60, 5  ;;  %v781_v10 = vrot.slane %v665_v60, 6  ;;  %v1121_v11 = vpop.f32.mrb[14].mxu1  ;;  %v479_v12 = vpop.f32.mrb[15].mxu0 }
 0x110   : > { %v840_v13 = vsel %vm810_vm6, %v836_v50, %v763_v2  ;;  %v789_v14 = vrot.slane %v665_v60, 7  ;;  %v699_v15 = vrot.slane %v631_v61, 4  ;;  %v707_v16 = vrot.slane %v631_v61, 5  ;;  %v1527_v18 = vpop.f32.mrb[15].mxu1 }
 0x111   : > { %v844_v19 = vsel %vm387_vm0, %v840_v13, %v771_v3  ;;  %v842_v20 = vsel %vm810_vm6, %v838_v54, %v765_v8  ;;  %v715_v25 = vrot.slane %v631_v61, 6  ;;  %v723_v26 = vrot.slane %v631_v61, 7 }
 0x112   : > { %v848_v27 = vsel %vm388_vm1, %v844_v19, %v779_v4  ;;  %v846_v28 = vsel %vm387_vm0, %v842_v20, %v773_v9  ;;  %v811_v31 = vsel %vm810_vm6, %v806_v55, %v699_v15  ;;  %v633_v32 = vmax.f32 %v1484_v21, %v625_v62 }
 0x113   : > { %v852_v33 = vsel %vm823_vm7, %v848_v27, %v787_v7  ;;  %v850_v34 = vsel %vm388_vm1, %v846_v28, %v781_v10  ;;  %v815_v37 = vsel %vm387_vm0, %v811_v31, %v707_v16  ;;  %v469_v38 = vadd.f32 %v1482_v17, %v1464_v23 }
 0x114   : > { %v1060_v39 = vpack.c.bf16 %v852_v33, %v852_v33  ;;  %v854_v40 = vsel %vm823_vm7, %v850_v34, %v789_v14  ;;  %v819_v42 = vsel %vm388_vm1, %v815_v37, %v715_v25  ;;  %v701_v43 = vrot.slane %v633_v32, 4 }
 0x115   : > { %v1064_v44 = vpack.c.bf16 %v854_v40, %v854_v40  ;;  %v824_v45 = vsel %vm823_vm7, %v819_v42, %v723_v26  ;;  %v709_v46 = vrot.slane %v633_v32, 5  ;;  %v717_v21 = vrot.slane %v633_v32, 6 }
 0x116   : > { %890 = vst.msk [vmem:[%s1543_s7 + $0x4] sm:$0xf] %vm888_vm8, %v1060_v39  ;;  %v1059_v47 = vpack.c.bf16 %v824_v45, %v824_v45  ;;  %v725_v17 = vrot.slane %v633_v32, 7  ;;  %v813_v48 = vsel %vm810_vm6, %v808_v1, %v701_v43  ;;  %v565_v49 = vmax.f32 %v469_v38, 0.0 }
 0x117   : > { %894 = vst.msk [vmem:[%s1543_s7 + $0x14] sm:$0xf] %vm888_vm8, %v1064_v44  ;;  %v817_v50 = vsel %vm387_vm0, %v813_v48, %v709_v46  ;;  %v533_v51 = vadd.f32 %v1486_v22, %v1464_v23  ;;  %v461_v52 = vadd.f32 %v1464_v23, %v1488_v24  ;;  %v525_v53 = vadd.f32 %v1464_v23, %v1490_v29 }
 0x118   : > { %889 = vst.msk [vmem:[%s1543_s7] sm:$0xf] %vm888_vm8, %v1059_v47  ;;  %v821_v54 = vsel %vm388_vm1, %v817_v50, %v717_v21  ;;  %v472_v55 = vadd.f32 %v1492_v30, %v1464_v23  ;;  %v536_v56 = vadd.f32 %v1494_v35, %v1464_v23  ;;  %v464_v22 = vadd.f32 %v1464_v23, %v1496_v36 }
 0x119   : > { %v826_v57 = vsel %vm823_vm7, %v821_v54, %v725_v17  ;;  %v581_v24 = vmax.f32 %v533_v51, 0.0  ;;  %v563_v59 = vmax.f32 %v461_v52, 0.0  ;;  %v579_v60 = vmax.f32 %v525_v53, 0.0 }
 0x11a   : > { %v1063_v29 = vpack.c.bf16 %v826_v57, %v826_v57  ;;  %v566_v61 = vmax.f32 %v472_v55, 0.0  ;;  %v582_v62 = vmax.f32 %v536_v56, 0.0  ;;  %v564_v1 = vmax.f32 %v464_v22, 0.0 }
 0x11b   : > { %v528_v2 = vadd.f32 %v1464_v23, %v1498_v41  ;;  %v485_v30 = vadd.f32 %v1510_v58, %v1464_v23  ;;  %v549_v35 = vadd.f32 %v1515_v63, %v1464_v23  ;;  %v477_v36 = vadd.f32 %v1464_v23, %v1517_v0 }
 0x11c   : > { %893 = vst.msk [vmem:[%s1543_s7 + $0x10] sm:$0xf] %vm888_vm8, %v1063_v29  ;;  %v541_v3 = vadd.f32 %v1464_v23, %v1520_v5  ;;  %v488_v4 = vadd.f32 %v1522_v6, %v1464_v23  ;;  %v552_v7 = vadd.f32 %v1121_v11, %v1464_v23  ;;  %v480_v41 = vadd.f32 %v1464_v23, %v479_v12 }
 0x11d   : > { %v580_v8 = vmax.f32 %v528_v2, 0.0  ;;  %v569_v58 = vmax.f32 %v485_v30, 0.0  ;;  %v585_v9 = vmax.f32 %v549_v35, 0.0  ;;  %v567_v10 = vmax.f32 %v477_v36, 0.0 }
 0x11e   : > { %v583_v63 = vmax.f32 %v541_v3, 0.0  ;;  %v570_v13 = vmax.f32 %v488_v4, 0.0  ;;  %v586_v14 = vmax.f32 %v552_v7, 0.0  ;;  %v568_v0 = vmax.f32 %v480_v41, 0.0 }
 0x11f   : > { %v593_v15 = vmax.f32 %v565_v49, %v569_v58  ;;  %v601_v16 = vmax.f32 %v581_v24, %v585_v9  ;;  %v591_v19 = vmax.f32 %v563_v59, %v567_v10  ;;  %v544_v5 = vadd.f32 %v1464_v23, %v1527_v18 }
 0x120   : > { %v599_v20 = vmax.f32 %v579_v60, %v583_v63  ;;  %v594_v6 = vmax.f32 %v566_v61, %v570_v13  ;;  %v602_v25 = vmax.f32 %v582_v62, %v586_v14  ;;  %v592_v11 = vmax.f32 %v564_v1, %v568_v0 }
 0x121   : > { %v640_v26 = vrot.slane %v593_v15, 1  ;;  %v642_v12 = vrot.slane %v601_v16, 1  ;;  %v608_v27 = vrot.slane %v591_v19, 1  ;;  %v584_v28 = vmax.f32 %v544_v5, 0.0 }
 0x122   : > { %v610_v31 = vrot.slane %v599_v20, 1  ;;  %v656_v32 = vrot.slane %v594_v6, 1  ;;  %v658_v33 = vrot.slane %v602_v25, 1  ;;  %v624_v44 = vrot.slane %v592_v11, 1 }
 0x123   : > { %v648_v34 = vmax.f32 %v593_v15, %v640_v26  ;;  %v650_v37 = vmax.f32 %v601_v16, %v642_v12  ;;  %v616_v38 = vmax.f32 %v591_v19, %v608_v27  ;;  %v600_v39 = vmax.f32 %v580_v8, %v584_v28 }
 0x124   : > { %v618_v40 = vmax.f32 %v599_v20, %v610_v31  ;;  %v664_v42 = vmax.f32 %v594_v6, %v656_v32  ;;  %v666_v43 = vmax.f32 %v602_v25, %v658_v33  ;;  %v632_v24 = vmax.f32 %v592_v11, %v624_v44 }
 0x125   : > { %v736_v23 = vrot.slane %v648_v34, 1  ;;  %v744_v18 = vrot.slane %v648_v34, 2  ;;  %v752_v45 = vrot.slane %v648_v34, 3  ;;  %v738_v46 = vrot.slane %v650_v37, 1 }
 0x126   : > { %v746_v21 = vrot.slane %v650_v37, 2  ;;  %v754_v47 = vrot.slane %v650_v37, 3  ;;  %v672_v17 = vrot.slane %v616_v38, 1  ;;  %v680_v48 = vrot.slane %v616_v38, 2 }
 0x127   : > { %v829_v49 = vsel %vm795_vm3, %v648_v34, %v736_v23  ;;  %v831_v50 = vsel %vm795_vm3, %v650_v37, %v738_v46  ;;  %v688_v51 = vrot.slane %v616_v38, 3  ;;  %v674_v52 = vrot.slane %v618_v40, 1 }
 0x128   : > { %v833_v53 = vsel %vm800_vm4, %v829_v49, %v744_v18  ;;  %v835_v54 = vsel %vm800_vm4, %v831_v50, %v746_v21  ;;  %v797_v55 = vsel %vm795_vm3, %v616_v38, %v672_v17  ;;  %v682_v56 = vrot.slane %v618_v40, 2 }
 0x129   : > { %v837_v22 = vsel %vm805_vm5, %v833_v53, %v752_v45  ;;  %v802_v57 = vsel %vm800_vm4, %v797_v55, %v680_v48  ;;  %v839_v59 = vsel %vm805_vm5, %v835_v54, %v754_v47  ;;  %v799_v29 = vsel %vm795_vm3, %v618_v40, %v674_v52 }
 0x12a   : > { %v807_v60 = vsel %vm805_vm5, %v802_v57, %v688_v51  ;;  %v764_v61 = vrot.slane %v664_v42, 4  ;;  %v804_v62 = vsel %vm800_vm4, %v799_v29, %v682_v56  ;;  %v772_v1 = vrot.slane %v664_v42, 5 }
 0x12b   : > { %v780_v2 = vrot.slane %v664_v42, 6  ;;  %v766_v30 = vrot.slane %v666_v43, 4  ;;  %v788_v35 = vrot.slane %v664_v42, 7  ;;  %v774_v3 = vrot.slane %v666_v43, 5 }
 0x12c   : > { %v841_v36 = vsel %vm810_vm6, %v837_v22, %v764_v61  ;;  %v782_v4 = vrot.slane %v666_v43, 6  ;;  %v790_v41 = vrot.slane %v666_v43, 7  ;;  %v700_v58 = vrot.slane %v632_v24, 4 }
 0x12d   : > { %v845_v7 = vsel %vm387_vm0, %v841_v36, %v772_v1  ;;  %v843_v8 = vsel %vm810_vm6, %v839_v59, %v766_v30  ;;  %v708_v63 = vrot.slane %v632_v24, 5  ;;  %v716_v13 = vrot.slane %v632_v24, 6 }
 0x12e   : > { %v849_v9 = vsel %vm388_vm1, %v845_v7, %v780_v2  ;;  %v847_v10 = vsel %vm387_vm0, %v843_v8, %v774_v3  ;;  %v724_v15 = vrot.slane %v632_v24, 7  ;;  %v812_v16 = vsel %vm810_vm6, %v807_v60, %v700_v58 }
 0x12f   : > { %v853_v14 = vsel %vm823_vm7, %v849_v9, %v788_v35  ;;  %v851_v0 = vsel %vm388_vm1, %v847_v10, %v782_v4  ;;  %v816_v20 = vsel %vm387_vm0, %v812_v16, %v708_v63  ;;  %v626_v6 = vrot.slane %v600_v39, 1 }
 0x130   : > { %v1062_v19 = vpack.c.bf16 %v853_v14, %v853_v14  ;;  %v855_v5 = vsel %vm823_vm7, %v851_v0, %v790_v41  ;;  %v690_v25 = vrot.slane %v618_v40, 3  ;;  %v820_v26 = vsel %vm388_vm1, %v816_v20, %v716_v13 }
 0x131   : > { %v1066_v11 = vpack.c.bf16 %v855_v5, %v855_v5  ;;  %v825_v12 = vsel %vm823_vm7, %v820_v26, %v724_v15  ;;  %v634_v27 = vmax.f32 %v600_v39, %v626_v6 }
 0x132   : > { %892 = vst.msk [vmem:[%s1543_s7 + $0xc] sm:$0xf] %vm888_vm8, %v1062_v19  ;;  %v809_v28 = vsel %vm805_vm5, %v804_v62, %v690_v25  ;;  %v1061_v31 = vpack.c.bf16 %v825_v12, %v825_v12 }
 0x133   : > { %896 = vst.msk [vmem:[%s1543_s7 + $0x1c] sm:$0xf] %vm888_vm8, %v1066_v11  ;;  %v702_v32 = vrot.slane %v634_v27, 4  ;;  %v710_v33 = vrot.slane %v634_v27, 5  ;;  %v718_v34 = vrot.slane %v634_v27, 6  ;;  %v726_v38 = vrot.slane %v634_v27, 7 }
 0x134   : > { %891 = vst.msk [vmem:[%s1543_s7 + $0x8] sm:$0xf] %vm888_vm8, %v1061_v31 }
 0x135   : > { %v814_v37 = vsel %vm810_vm6, %v809_v28, %v702_v32 }
 0x136   : > { %v818_v39 = vsel %vm387_vm0, %v814_v37, %v710_v33 }
 0x137   : > { %v822_v40 = vsel %vm388_vm1, %v818_v39, %v718_v34 }
 0x138   : > { %v827_v42 = vsel %vm823_vm7, %v822_v40, %v726_v38 }
 0x139   : > { %v1065_v43 = vpack.c.bf16 %v827_v42, %v827_v42 }
 0x13b   : > { %895 = vst.msk [vmem:[%s1543_s7 + $0x18] sm:$0xf] %vm888_vm8, %v1065_v43 }
 0x13c   : > { %1231 = shalt.err (!%p1228_p7)
}
 0x13d   : > { %s1232_s4 = scalar_lea.hbm %s1625_s15, 512  ;;  %s1236_s7 = scalar_lea.hbm %s1688_s3, 4096 }
 0x13e   : > { %p1233_p9 = scmp.ne.s32.totalorder %s1625_s15, %s1232_s4  ;;  %p1237_p12 = scmp.lt.u32.totalorder %s1625_s15, %s1688_s3 }
 0x13f   : > { %p1238_p13 = scmp.lt.u32.totalorder %s1236_s7, %s1232_s4  ;;  %p1240_p1 = scmp.lt.u32.totalorder %s1232_s4, %s1625_s15 }
 0x140   : > { %p1234_p10 = pnand %p1233_p9, %p1389_p3 }
 0x141   : > { %p1239_p0 = por %p1238_p13, %p1237_p12 }
 0x142   : > { %p1235_p11 = pneg %p1234_p10 }
 0x143   : > { %p1241_p2 = por %p1240_p1, %p1239_p0 }
 0x145   : > { %p1242_p4 = pnand %p1241_p2, %p1235_p11 }
 0x147   : > { %1245 = shalt.err (!%p1242_p4)
}
 0x148   : > { %s1316_s16 = smov 64   ;;  %s1317_s20 = smov 4  }
 0x149   : > { %1126 = dma.vmem_to_hbm [thread:$0]  (%p1389_p3), %s1627_s11, 512, %s1625_s15, %s1633_s21, %s1316_s16, %s1316_s16, %s1317_s20  }
 0x14a PF: > { %p1132_p5 = scmp.ge.s32.totalorder %s1312_s19, 2  ;;  %s929_s8 = sand.u32 1, %s1284_s12  }
 0x14b   : > { %s930_s24 = scalar_lea.sflag [#allocation3], %s929_s8 }
 0x14c   : > { %p1129_p6 = pnand %p1132_p5, %p1398_p8 }
 0x14e   : > { %1279 = dma.done.wait (!%p1129_p6), %s930_s24, 512  }
 0x14f   : > { %1281 = vsyncadd (!%p1129_p6), %s930_s24, 4294966784  ;;  %s16_s19 = sadd.s32 1, %s1312_s19   ;;  %s1691_s12 = smov %s1288_s13 }
 0x150   : > { %p13_p7 = scmp.ge.s32.totalorder %s16_s19, 10   ;;  %s1692_s13 = smov %s1292_s14 }
 0x151   : > { %s1693_s14 = smov %s1407_s30  ;;  %s1694_s15 = smov %s1304_s17 }
 0x152   : > { %s1695_s16 = smov %s1308_s18  ;;  %s1696_s17 = smov %s1699_s22 }
 0x153   : > { %s1697_s18 = smov %s1703_s23  ;;  %15 = sbr.rel (!%p13_p7) target bundleno = 5 (0x5), region = 67 }
 0x15a   :  { %935 = vsyncpa [#allocation3], 1 }
 0x15b   :  { %937 = vsyncpa [#allocation3 + $0x1], 1 }

</bundles_post_ra>
